<compile_context>
chip_gen: v6e
topology: v6e:2x2x1
jax: 0.10.0
libtpu: 0.0.40
codegen_flags: <defaults>
</compile_context>

<pallas_src>
import math

import jax
import jax.numpy as jnp
from jax.experimental import pallas as pl
from jax.experimental.pallas import tpu as pltpu


def _scaling_kernel(x_ref, w_ref, o_ref, acc_ref):
    # x_ref: (rows_per_block, tile_k) bf16
    # w_ref: (tile_k, lanes_out)      bf16
    # o_ref: (rows_per_block, lanes_out) f32
    # acc_ref: f32 accumulator (persists across the contraction grid axis)
    @pl.when(pl.program_id(1) == 0)
    def _init():
        acc_ref[...] = jnp.zeros_like(acc_ref)

    acc_ref[...] += jnp.dot(
        x_ref[...], w_ref[...], preferred_element_type=jnp.float32
    )

    @pl.when(pl.program_id(1) == pl.num_programs(1) - 1)
    def _finalize():
        o_ref[...] = acc_ref[...].astype(o_ref.dtype)


def scaling_layer(x: jax.Array, cl: jax.Array, cr: jax.Array,
                  *, target_block_bytes: int = 4 << 20) -> jax.Array:
    """Computes cl @ x[b, c] @ cr for every (b, c) plane (torch semantics)."""
    B, C, H, W = x.shape
    H_out, H_cl = cl.shape
    W_cr, W_out = cr.shape
    assert H_cl == H and W_cr == W, "cl/cr dims must match the spatial dims of x"

    N = B * C
    HW = H * W
    P = H_out * W_out
    LANE = 128
    SUBLANE = 16            # bf16 sublane tile
    K_BUDGET = 8 << 20      # max bf16 bytes for one VMEM-resident weight block

    # ---- fused weight -------------------------------------------------------
    w = jnp.kron(cl.T.astype(jnp.float32), cr.astype(jnp.float32))  # (HW, P)

    g = LANE // math.gcd(P, LANE)          # planes/row needed for lane-dense P
    p_pad = pl.cdiv(P, LANE) * LANE
    use_group = (g <= 4) and (N % g == 0)
    if use_group and g > 1:
        # grouping inflates the weight by g^2; prefer column padding if cheaper
        if (g * HW) * (g * P) * 2 > K_BUDGET and HW * p_pad * 2 <= K_BUDGET:
            use_group = False

    if use_group:
        if g > 1:
            w = jnp.kron(jnp.eye(g, dtype=w.dtype), w)   # (g*HW, g*P) block-diag
        lanes_in, lanes_out, col_pad = g * HW, g * P, 0
    else:
        g = 1
        col_pad = p_pad - P
        if col_pad:
            w = jnp.pad(w, ((0, 0), (0, col_pad)))       # zero output columns
        lanes_in, lanes_out = HW, p_pad

    w = w.astype(jnp.bfloat16)
    x_rows = x.astype(jnp.bfloat16).reshape(N // g, lanes_in)   # reshapes are free
    rows_total = N // g

    # ---- contraction tiling (only if W does not fit VMEM) -------------------
    if lanes_in * lanes_out * 2 <= K_BUDGET:
        tile_k, k_blocks = lanes_in, 1
    else:
        if lanes_in % LANE != 0:
            # TODO(synk): zero-pad the contraction dim of x and W for huge,
            # non-128-aligned planes; not needed for ScalingLayer-sized inputs.
            raise NotImplementedError("ScalingLayer plane too large for fused weight")
        max_tk = max(LANE, (K_BUDGET // (lanes_out * 2)) // LANE * LANE)
        n128 = lanes_in // LANE
        tile_k = LANE
        for d in range(1, n128 + 1):                     # exact divisor -> no ragged
            if n128 % d == 0 and d * LANE <= max_tk:     # contraction block (would
                tile_k = d * LANE                        # corrupt the accumulator)
        k_blocks = lanes_in // tile_k

    # ---- row (collapsed B*C) tiling -----------------------------------------
    per_row_bytes = lanes_in * 2 + lanes_out * 4         # bf16 in + f32 out
    rows_target = max(1, target_block_bytes // per_row_bytes)
    if rows_total > SUBLANE:
        # keep >= 2 grid steps so v7x can shard the parallel axis over both TCs
        rows_target = min(rows_target, pl.cdiv(rows_total, 2))
    if rows_target >= rows_total or rows_total <= SUBLANE:
        rows_per_block = rows_total                      # block == full dim: always legal
    else:
        rows_per_block = max(SUBLANE, (rows_target // SUBLANE) * SUBLANE)

    def _vmem_est(rpb):
        return (2 * rpb * tile_k * 2          # x slab, double-buffered
                + 2 * tile_k * lanes_out * 2  # W block, double-buffered
                + 2 * rpb * lanes_out * 4     # out slab, double-buffered
                + rpb * lanes_out * 4         # f32 accumulator scratch
                + (2 << 20))                  # margin for compiler scratch

    while rows_per_block > SUBLANE and _vmem_est(rows_per_block) > (40 << 20):
        rows_per_block = max(SUBLANE, (rows_per_block // 2 // SUBLANE) * SUBLANE)
    if _vmem_est(rows_per_block) > (48 << 20):
        # TODO(synk): also tile lanes_out (output columns) for very large planes.
        raise NotImplementedError("ScalingLayer plane too large for VMEM-resident tiling")

    grid = (pl.cdiv(rows_total, rows_per_block), k_blocks)

    out2d = pl.pallas_call(
        _scaling_kernel,
        out_shape=jax.ShapeDtypeStruct((rows_total, lanes_out), jnp.float32),
        grid=grid,
        in_specs=[
            # slab of flattened input planes (g planes per row)
            pl.BlockSpec((rows_per_block, tile_k), lambda i, k: (i, k)),
            # fused weight block (constant across the row axis -> VMEM-resident)
            pl.BlockSpec((tile_k, lanes_out), lambda i, k: (k, 0)),
        ],
        out_specs=pl.BlockSpec((rows_per_block, lanes_out), lambda i, k: (i, 0)),
        scratch_shapes=[pltpu.VMEM((rows_per_block, lanes_out), jnp.float32)],
        compiler_params=pltpu.CompilerParams(
            dimension_semantics=("parallel", "arbitrary"),
            vmem_limit_bytes=int(min(max(_vmem_est(rows_per_block), 16 << 20),
                                     48 << 20)),
        ),
        cost_estimate=pl.CostEstimate(
            flops=2 * rows_total * lanes_in * lanes_out,
            transcendentals=0,
            bytes_accessed=(rows_total * lanes_in * 2
                            + lanes_in * lanes_out * 2
                            + rows_total * lanes_out * 4),
        ),
    )(x_rows, w)

    if col_pad:
        out2d = out2d[:, :P]                 # only on the column-padded fallback path
    return out2d.reshape(B, C, H_out, W_out)


if __name__ == "__main__":
    # Small deterministic example consistent with the module's forward:
    #   inp: (B=2, C=4, H=16, W=16), cl: (8, 16), cr: (16, 8) -> out: (2, 4, 8, 8)
    B, C, H, W = 2, 4, 16, 16
    H_out, W_out = 8, 8

    key = jax.random.PRNGKey(0)
    k_x, k_cl, k_cr = jax.random.split(key, 3)
    x = jax.random.normal(k_x, (B, C, H, W), dtype=jnp.float32)
    cl = jax.random.normal(k_cl, (H_out, H), dtype=jnp.float32)
    cr = jax.random.normal(k_cr, (W, W_out), dtype=jnp.float32)

    out = scaling_layer(x, cl, cr)
    jax.block_until_ready(out)

    # Reference: same semantics as torch (cl @ x @ cr per (b, c) plane).
    ref = jnp.einsum("oh,bchw,wp->bcop", cl, x, cr,
                     precision=jax.lax.Precision.HIGHEST)
    assert out.shape == (B, C, H_out, W_out)
    err = float(jnp.max(jnp.abs(out - ref)))
    scale = float(jnp.max(jnp.abs(ref))) + 1e-6
    # bf16 inputs with f32 accumulation: expect well under ~3% of the data scale.
    assert err <= 3e-2 * scale + 1e-2, (err, scale)

    print("KERNEL_OK")
</pallas_src>

<mosaic_0001>
module attributes {stable_mosaic.version = 11 : i64} {
  func.func @_scaling_kernel(%arg0: i32, %arg1: i32, %arg2: memref<4x512xbf16, #tpu.memory_space<vmem>>, %arg3: memref<512x128xbf16, #tpu.memory_space<vmem>>, %arg4: memref<4x128xf32, #tpu.memory_space<vmem>>, %arg5: memref<4x128xf32, #tpu.memory_space<vmem>>) attributes {dimension_semantics = [#tpu.dimension_semantics<parallel>, #tpu.dimension_semantics<arbitrary>], iteration_bounds = array<i64: 1, 1>, scalar_prefetch = 0 : i64, scratch_operands = 1 : i64, tpu.core_type = #tpu.core_type<tc>, window_params = [{transform_indices = @transform_0, window_bounds = array<i64: 4, 512>}, {transform_indices = @transform_1, window_bounds = array<i64: 512, 128>}, {transform_indices = @transform_2, window_bounds = array<i64: 4, 128>}]} {
    %c0_i32 = arith.constant 0 : i32
    %0 = arith.cmpi eq, %arg1, %c0_i32 : i32
    %1 = arith.extui %0 : i1 to i32
    %c0_i32_0 = arith.constant 0 : i32
    %2 = arith.cmpi ne, %1, %c0_i32_0 : i32
    scf.if %2 {
      %cst_10 = arith.constant 0.000000e+00 : f32
      %12 = vector.broadcast %cst_10 : f32 to vector<4x128xf32>
      %c0_11 = arith.constant 0 : index
      %c0_12 = arith.constant 0 : index
      %13 = vector.load %arg5[%c0_11, %c0_12] : memref<4x128xf32, #tpu.memory_space<vmem>>, vector<4x128xf32>
      tpu.vector_store %arg5[%c0_11, %c0_12], %12 {strides = array<i32>} : memref<4x128xf32, #tpu.memory_space<vmem>>, vector<4x128xf32>,
    } else {
    }
    %c0 = arith.constant 0 : index
    %c0_1 = arith.constant 0 : index
    %3 = vector.load %arg5[%c0, %c0_1] : memref<4x128xf32, #tpu.memory_space<vmem>>, vector<4x128xf32>
    %c0_2 = arith.constant 0 : index
    %c0_3 = arith.constant 0 : index
    %4 = vector.load %arg2[%c0_2, %c0_3] : memref<4x512xbf16, #tpu.memory_space<vmem>>, vector<4x512xbf16>
    %c0_4 = arith.constant 0 : index
    %c0_5 = arith.constant 0 : index
    %5 = vector.load %arg3[%c0_4, %c0_5] : memref<512x128xbf16, #tpu.memory_space<vmem>>, vector<512x128xbf16>
    %cst = arith.constant dense<0.000000e+00> : vector<4x128xf32>
    %6 = tpu.matmul %4, %5, %cst {dimension_numbers = #tpu.dot_dimension_numbers<[1], [0], [0], [1], [0, 0, 1, 1], [], []>} : vector<4x512xbf16>, vector<512x128xbf16>, vector<4x128xf32> -> vector<4x128xf32>
    %7 = arith.addf %3, %6 : vector<4x128xf32>
    %c0_6 = arith.constant 0 : index
    %c0_7 = arith.constant 0 : index
    %8 = vector.load %arg5[%c0_6, %c0_7] : memref<4x128xf32, #tpu.memory_space<vmem>>, vector<4x128xf32>
    tpu.vector_store %arg5[%c0_6, %c0_7], %7 {strides = array<i32>} : memref<4x128xf32, #tpu.memory_space<vmem>>, vector<4x128xf32>,
    %c0_i32_8 = arith.constant 0 : i32
    %9 = arith.cmpi eq, %arg1, %c0_i32_8 : i32
    %10 = arith.extui %9 : i1 to i32
    %c0_i32_9 = arith.constant 0 : i32
    %11 = arith.cmpi ne, %10, %c0_i32_9 : i32
    scf.if %11 {
      %c0_10 = arith.constant 0 : index
      %c0_11 = arith.constant 0 : index
      %12 = vector.load %arg5[%c0_10, %c0_11] : memref<4x128xf32, #tpu.memory_space<vmem>>, vector<4x128xf32>
      %c0_12 = arith.constant 0 : index
      %c0_13 = arith.constant 0 : index
      %13 = vector.load %arg4[%c0_12, %c0_13] : memref<4x128xf32, #tpu.memory_space<vmem>>, vector<4x128xf32>
      tpu.vector_store %arg4[%c0_12, %c0_13], %12 {strides = array<i32>} : memref<4x128xf32, #tpu.memory_space<vmem>>, vector<4x128xf32>,
    } else {
    }
    return
  }
  func.func @transform_0(%arg0: i32, %arg1: i32) -> (i32, i32) {
    %c0_i32 = arith.constant 0 : i32
    return %arg0, %arg1 : i32, i32
  }
  func.func @transform_1(%arg0: i32, %arg1: i32) -> (i32, i32) {
    %c0_i32 = arith.constant 0 : i32
    %c0_i32_0 = arith.constant 0 : i32
    return %arg1, %c0_i32 : i32, i32
  }
  func.func @transform_2(%arg0: i32, %arg1: i32) -> (i32, i32) {
    %c0_i32 = arith.constant 0 : i32
    %c0_i32_0 = arith.constant 0 : i32
    return %arg0, %c0_i32 : i32, i32
  }
}

</mosaic_0001>

<bundles_post_ra>
// kernel: tpu_custom_call.1
= control target key start
LH: loop header
LB: loop body
LE: loop exit
PB: predicated region body
PF: predicated region fallthrough
CT: control target
= control target key end

     0   :  { %7 = vsyncpa [#allocation4], 0  ;;  %s640_s0 = inlined_call_operand.hbm [shape: bf16[4,512], index: 0, kind: input, shape index: {}]   ;;  %s641_s1 = inlined_call_operand.hbm [shape: bf16[512,128], index: 1, kind: input, shape index: {}]   ;;  %s642_s2 = inlined_call_operand.hbm [shape: f32[4,128], index: 2, kind: output, shape index: {}]  }
   0x1   :  { %8 = vsyncpa [#allocation7], 0 }
   0x2   :  { %9 = vsyncpa [#allocation5], 0  ;;  %s609_s9 = smov [#allocation3]   ;;  %s610_s11 = smov [#allocation6]  }
   0x3   :  { %s16_s10 = sshll.u32 %s609_s9, 4  ;;  %s25_s12 = sshll.u32 %s610_s11, 4  ;;  %s17_s10 = int_to_ptr.vmem [resolvable:$true] %s16_s10  ;;  %s26_s12 = int_to_ptr.vmem [resolvable:$true] %s25_s12 }
   0x4   :  { %s551_s13 = scalar_lea.vmem %s17_s10, 128  ;;  %p556_p1 = scmp.lt.s32.totalorder %s17_s10, %s17_s10 }
   0x5   :  { %p552_p0 = scmp.ne.s32.totalorder %s17_s10, %s551_s13  ;;  %p557_p2 = scmp.lt.s32.totalorder %s551_s13, %s551_s13 }
   0x7   :  { %p558_p3 = por %p557_p2, %p556_p1 }
   0x9   :  { %p559_p4 = pnand %p558_p3, %p552_p0 }
   0xb   :  { %562 = shalt.err (!%p559_p4)
}
   0xc   :  { %19 = dma.hbm_to_vmem [thread:$0]  %s640_s0, 128, %s17_s10, [#allocation4]  }
   0xd   :  { %s571_s16 = scalar_lea.vmem %s26_s12, 4096  ;;  %p576_p6 = scmp.lt.s32.totalorder %s26_s12, %s26_s12 }
   0xe   :  { %p572_p5 = scmp.ne.s32.totalorder %s26_s12, %s571_s16  ;;  %p577_p7 = scmp.lt.s32.totalorder %s571_s16, %s571_s16 }
  0x10   :  { %p578_p8 = por %p577_p7, %p576_p6 }
  0x12   :  { %p579_p9 = pnand %p578_p8, %p572_p5 }
  0x14   :  { %582 = shalt.err (!%p579_p9)
}
  0x15   :  { %s611_s17 = smov 64   ;;  %s612_s18 = smov 4  }
  0x16   :  { %31 = dma.hbm_to_vmem [thread:$0]  %s641_s1, 4096, %s26_s12, [#allocation7], %s611_s17, %s611_s17, %s612_s18  }
  0x17   :  { %603 = dma.done.wait [#allocation4], 128  }
  0x18   :  { %604 = vsyncadd [#allocation4], 4294967168 }
  0x19   :  { %605 = dma.done.wait [#allocation7], 4096  }
  0x1a   :  { %606 = vsyncadd [#allocation7], 4294963200  ;;  %v510_v0 = vld [vmem:[#allocation6 + $0x78] sm:$0xff]   ;;  %v514_v4 = vld [vmem:[#allocation6 + $0x70] sm:$0xff]   ;;  %v613_v22 = vmov 1983009808   ;;  %v115_v24 = vlaneseq }
  0x1b   :  { %v511_v1 = vld [vmem:[#allocation6 + $0xf8] sm:$0xff]   ;;  %459 = vmatprep.subr.bf16.mxu0 %v510_v0  ;;  %v515_v5 = vld [vmem:[#allocation6 + $0xf0] sm:$0xff]   ;;  %v518_v8 = vld [vmem:[#allocation6 + $0x68] sm:$0xff]   ;;  %v113_v23 = vunpack.c.l.s4 %v613_v22  ;;  %v614_v44 = vmov 0.0   ;;  %s615_s0 = smov [#allocation8]  }
  0x1c   :  { %v512_v2 = vld [vmem:[#allocation6 + $0x38] sm:$0xff]   ;;  %481 = vmatprep.subr.bf16.mxu1 %v511_v1  ;;  %v516_v6 = vld [vmem:[#allocation6 + $0x30] sm:$0xff]   ;;  %v519_v9 = vld [vmem:[#allocation6 + $0xe8] sm:$0xff]   ;;  %v116_v30 = vshrl.u32 %v115_v24, 7  ;;  %43 = vst [vmem:[#allocation2] sm:$0xf] %v614_v44 }
  0x1d   :  { %v513_v3 = vld [vmem:[#allocation6 + $0xb8] sm:$0xff]   ;;  %460 = vmatpush3.bf16.msra.mxu0 %v512_v2  ;;  %v517_v7 = vld [vmem:[#allocation6 + $0xb0] sm:$0xff]   ;;  %v520_v10 = vld [vmem:[#allocation6 + $0x28] sm:$0xff]   ;;  %v114_v29 = vunpack.c.0.s8 %v113_v23  ;;  %s417_s1 = sshll.u32 %s615_s0, 4  ;;  %s418_s1 = int_to_ptr.vmem [resolvable:$true] %s417_s1 }
  0x1e   :  { %482 = vmatpush3.bf16.msra.mxu1 %v513_v3  ;;  %461 = vmatprep.subr.bf16.mxu0 %v514_v4  ;;  %v521_v11 = vld [vmem:[#allocation6 + $0xa8] sm:$0xff]   ;;  %v522_v12 = vld [vmem:[#allocation6 + $0x60] sm:$0xff]   ;;  %v526_v16 = vld [vmem:[#allocation6 + $0x58] sm:$0xff]   ;;  %s583_s21 = scalar_lea.vmem %s418_s1, 64  ;;  %p588_p11 = scmp.lt.s32.totalorder %s418_s1, %s418_s1 }
  0x1f   :  { %483 = vmatprep.subr.bf16.mxu1 %v515_v5  ;;  %v523_v13 = vld [vmem:[#allocation6 + $0xe0] sm:$0xff]   ;;  %v527_v17 = vld [vmem:[#allocation6 + $0xd8] sm:$0xff]   ;;  %v530_v20 = vld [vmem:[#allocation6 + $0x50] sm:$0xff]   ;;  %v117_v35 = vsub.s32 %v114_v29, %v116_v30  ;;  %p584_p10 = scmp.ne.s32.totalorder %s418_s1, %s583_s21  ;;  %p589_p12 = scmp.lt.s32.totalorder %s583_s21, %s583_s21 }
  0x20   :  { %v524_v14 = vld [vmem:[#allocation6 + $0x20] sm:$0xff]   ;;  %v528_v18 = vld [vmem:[#allocation6 + $0x18] sm:$0xff]   ;;  %v531_v21 = vld [vmem:[#allocation6 + $0xd0] sm:$0xff]  }
  0x21   :  { %462 = vmatpush3.bf16.msra.mxu0 %v516_v6  ;;  %v525_v15 = vld [vmem:[#allocation6 + $0xa0] sm:$0xff]   ;;  %v529_v19 = vld [vmem:[#allocation6 + $0x98] sm:$0xff]   ;;  %v532_v25 = vld [vmem:[#allocation6 + $0x10] sm:$0xff]   ;;  %p590_p13 = por %p589_p12, %p588_p11 }
  0x22   :  { %484 = vmatpush3.bf16.msra.mxu1 %v517_v7  ;;  %463 = vmatprep.subr.bf16.mxu0 %v518_v8  ;;  %v533_v26 = vld [vmem:[#allocation6 + $0x90] sm:$0xff]   ;;  %v534_v27 = vld [vmem:[#allocation6 + $0x48] sm:$0xff]   ;;  %v538_v33 = vld [vmem:[#allocation6 + $0x40] sm:$0xff]  }
  0x23   :  { %485 = vmatprep.subr.bf16.mxu1 %v519_v9  ;;  %v535_v28 = vld [vmem:[#allocation6 + $0xc8] sm:$0xff]   ;;  %v539_v34 = vld [vmem:[#allocation6 + $0xc0] sm:$0xff]   ;;  %v45_v38 = vld [vmem:[#allocation3] sm:$0xff]  ;;  %p591_p0 = pnand %p590_p13, %p584_p10 }
  0x24   :  { %v536_v31 = vld [vmem:[#allocation6 + $0x8] sm:$0xff]   ;;  %v540_v36 = vld [vmem:[#allocation6] sm:$0xff]   ;;  %v118_v39 = vrot.slane %v45_v38, %v117_v35  ;;  %v111_v40 = vcombine.high %v45_v38, %v45_v38  ;;  %v44_v52 = vld [vmem:[#allocation2] sm:$0xf] }
  0x25   :  { %464 = vmatpush3.bf16.msra.mxu0 %v520_v10  ;;  %v537_v32 = vld [vmem:[#allocation6 + $0x88] sm:$0xff]   ;;  %v541_v37 = vld [vmem:[#allocation6 + $0x80] sm:$0xff]  }
  0x26   :  { %486 = vmatpush3.bf16.msra.mxu1 %v521_v11  ;;  %465 = vmatprep.subr.bf16.mxu0 %v522_v12  ;;  %v126_v41 = vcombine.high %v118_v39, %v118_v39  ;;  %v125_v42 = vrot.slane %v111_v40, %v117_v35 }
  0x27   :  { %487 = vmatprep.subr.bf16.mxu1 %v523_v13 }
  0x28   :  { %356 = vmatprep.mubr.bf16.mxu0 %v126_v41  ;;  %v127_v43 = vcombine.high %v125_v42, %v125_v42 }
  0x29   :  { %466 = vmatpush3.bf16.msra.mxu0 %v524_v14 }
  0x2a   :  { %488 = vmatpush3.bf16.msra.mxu1 %v525_v15  ;;  %467 = vmatprep.subr.bf16.mxu0 %v526_v16 }
  0x2b   :  { %489 = vmatprep.subr.bf16.mxu1 %v527_v17  ;;  %396 = vmatprep.mubr.bf16.mxu1 %v127_v43 }
  0x2d   :  { %468 = vmatpush3.bf16.msra.mxu0 %v528_v18 }
  0x2e   :  { %490 = vmatpush3.bf16.msra.mxu1 %v529_v19  ;;  %469 = vmatprep.subr.bf16.mxu0 %v530_v20 }
  0x2f   :  { %491 = vmatprep.subr.bf16.mxu1 %v531_v21 }
  0x31   :  { %470 = vmatpush3.bf16.msra.mxu0 %v532_v25 }
  0x32   :  { %492 = vmatpush3.bf16.msra.mxu1 %v533_v26  ;;  %471 = vmatprep.subr.bf16.mxu0 %v534_v27 }
  0x33   :  { %493 = vmatprep.subr.bf16.mxu1 %v535_v28 }
  0x35   :  { %472 = vmatpush3.bf16.msra.mxu0 %v536_v31 }
  0x36   :  { %494 = vmatpush3.bf16.msra.mxu1 %v537_v32  ;;  %473 = vmatprep.subr.bf16.mxu0 %v538_v33 }
  0x37   :  { %495 = vmatprep.subr.bf16.mxu1 %v539_v34 }
  0x39   :  { %474 = vmatpush3.bf16.msra.mxu0 %v540_v36 }
  0x3a   :  { %496 = vmatpush3.bf16.msra.mxu1 %v541_v37 }
  0x3c   :  { %357 = vmatmul.mubr.bf16.vlgmr.msra.gmra.mxu0 %v118_v39 }
  0x3d   :  { %397 = vmatmul.mubr.bf16.vlgmr.msra.gmra.mxu1 %v125_v42 }
  0xfc   :  { %v475_v45 = vpop.f32.mrf.mxu0 }
  0xfd   :  { %v497_v46 = vpop.f32.mrf.mxu1 }
  0xfe   :  { %v476_v47 = vpop.f32.mrf.mxu0 }
  0xff   :  { %v477_v48 = vadd.f32 %v476_v47, %v475_v45  ;;  %v498_v49 = vpop.f32.mrf.mxu1 }
 0x100   :  { %v478_v50 = vpop.f32.mrf.mxu0  ;;  %v499_v51 = vadd.f32 %v498_v49, %v497_v46 }
 0x101   :  { %v500_v53 = vpop.f32.mrf.mxu1 }
 0x102   :  { %v479_v54 = vpop.f32.mrf.mxu0  ;;  %v399_v55 = vadd.f32 %v499_v51, %v477_v48 }
 0x103   :  { %v501_v56 = vpop.f32.mrf.mxu1 }
 0x104   :  { %v404_v57 = vadd.f32 %v399_v55, %v44_v52 }
 0x106   :  { %405 = vst [vmem:[#allocation2] sm:$0xf] %v404_v57 }
 0x10d   :  { %v409_v58 = vld [vmem:[#allocation2] sm:$0xf] }
 0x10e   :  { %410 = vst [vmem:[#allocation8] sm:$0xf] %v409_v58 }
 0x10f   :  { %594 = shalt.err (!%p591_p0)
}
 0x110   :  { %420 = dma.vmem_to_hbm [thread:$0]  %s418_s1, 64, %s642_s2, [#allocation5]  }
 0x111   :  { %607 = dma.done.wait [#allocation5], 64  }
 0x112   :  { %608 = vsyncadd [#allocation5], 4294967232 }
 0x113   :  { %424 = vsyncpa [#allocation4], 1 }
 0x114   :  { %425 = vsyncpa [#allocation7], 1 }
 0x115   :  { %426 = vsyncpa [#allocation5], 1 }

</bundles_post_ra>
